<compile_context>
chip_gen: v5e
topology: v5e:2x2
jax: 0.10.0
libtpu: 0.0.40
codegen_flags: <defaults>
</compile_context>

<pallas_src>
import functools

import jax
import jax.numpy as jnp
from jax import lax
from jax.experimental import pallas as pl
from jax.experimental.pallas import tpu as pltpu


def _deep_hash_loss_kernel(sf_ref, bc_row_ref, bd_row_ref, bc_col_ref,
                           bd_col_ref, out_ref, *, lambda1, lambda2, mu_d,
                           d_clamp):
    j = pl.program_id(1)

    # Zero the resident per-row accumulator at the first column block.
    @pl.when(j == 0)
    def _():
        out_ref[...] = jnp.zeros_like(out_ref)

    # t = d * clamp(mu * S_F, max=1) = min((mu*d) * S_F, d).
    # Working d-scaled removes three per-element (1/d) multiplies (VALU is the
    # binding unit on v6e/v7x); the wrapper divides the final scalar by d^2.
    t = jnp.minimum(jnp.float32(mu_d) * sf_ref[...], jnp.float32(d_clamp))

    # A @ B^T form: contract dim 1 of both operands; bf16 in, f32 accumulate
    # on the MXU, no in-kernel transpose.
    dn = (((1,), (1,)), ((), ()))
    cd = lax.dot_general(bc_row_ref[...], bd_col_ref[...], dn,
                         preferred_element_type=jnp.float32)
    cc = lax.dot_general(bc_row_ref[...], bc_col_ref[...], dn,
                         preferred_element_type=jnp.float32)
    dd = lax.dot_general(bd_row_ref[...], bd_col_ref[...], dn,
                         preferred_element_type=jnp.float32)

    # Fused residual; one lane-axis reduce per block (XLU, off the VALU path).
    r = (t - cd) ** 2
    r = r + jnp.float32(lambda1) * (t - cc) ** 2
    r = r + jnp.float32(lambda2) * (t - dd) ** 2

    out_ref[...] += jnp.sum(r, axis=1, keepdims=True)


def _round_up(x, m):
    return ((x + m - 1) // m) * m


def _pick_tile(n, maximum, multiple):
    """Largest multiple of `multiple` <= maximum that divides n."""
    t = min(maximum, n)
    t = (t // multiple) * multiple
    while t > multiple:
        if n % t == 0:
            return t
        t -= multiple
    return multiple


def _pad2(x, rows, cols):
    pr = rows - x.shape[0]
    pc = cols - x.shape[1]
    if pr or pc:
        x = jnp.pad(x, ((0, pr), (0, pc)))
    return x


def deep_hash_loss(S_F, B_C, B_D, *, lambda1, lambda2, mu, tm=None, tn=None):
    N = S_F.shape[0]
    d = B_C.shape[1]
    assert S_F.shape == (N, N)
    assert B_C.shape == (N, d) and B_D.shape == (N, d)

    # Pad N up to a multiple of 128; padded rows/cols contribute zero residual
    # (S_F pad is 0 -> t = 0, code pad is 0 -> matmul contribution 0).
    Np = max(_round_up(N, 128), 128)
    if tm is None:
        tm = _pick_tile(Np, 256, 128)
    if tn is None:
        tn = _pick_tile(Np, 512, 128)
    assert Np % tm == 0 and Np % tn == 0

    sf = _pad2(S_F.astype(jnp.float32), Np, Np)
    # +/-1 hash codes are exact in bf16; halves code VMEM + doubles MXU rate.
    bc = _pad2(B_C.astype(jnp.bfloat16), Np, d)
    bd = _pad2(B_D.astype(jnp.bfloat16), Np, d)

    kernel = functools.partial(
        _deep_hash_loss_kernel,
        lambda1=float(lambda1), lambda2=float(lambda2),
        mu_d=float(mu) * float(d), d_clamp=float(d))

    # VMEM budget: double-buffered S_F block, double-buffered row/col code
    # blocks, output block, PLUS the materialized (tm, tn) f32 intermediates
    # (t, cd, cc, dd, r).  Capped at 48 MiB to leave headroom on v7x.
    sf_block = tm * tn * 4
    code_blocks = 2 * (tm * d * 2 + tn * d * 2)
    out_block = tm * 4
    intermediates = 5 * tm * tn * 4
    vmem_bytes = 2 * (sf_block + code_blocks + out_block) + intermediates
    vmem_limit = min(max(int(1.3 * vmem_bytes) + (4 << 20), 16 << 20), 48 << 20)

    cost = pl.CostEstimate(
        flops=3 * 2 * Np * Np * d + 13 * Np * Np,
        transcendentals=0,
        bytes_accessed=4 * Np * Np + 2 * (Np // tm) * Np * d * 2
                       + 2 * Np * d * 2 + 4 * Np,
    )

    partials = pl.pallas_call(
        kernel,
        out_shape=jax.ShapeDtypeStruct((Np, 1), jnp.float32),
        grid_spec=pltpu.PrefetchScalarGridSpec(
            num_scalar_prefetch=0,
            grid=(Np // tm, Np // tn),
            in_specs=[
                pl.BlockSpec((tm, tn), lambda i, j: (i, j)),  # S_F tile
                pl.BlockSpec((tm, d), lambda i, j: (i, 0)),   # B_C row block
                pl.BlockSpec((tm, d), lambda i, j: (i, 0)),   # B_D row block
                pl.BlockSpec((tn, d), lambda i, j: (j, 0)),   # B_C col block
                pl.BlockSpec((tn, d), lambda i, j: (j, 0)),   # B_D col block
            ],
            out_specs=pl.BlockSpec((tm, 1), lambda i, j: (i, 0)),
        ),
        compiler_params=pltpu.CompilerParams(
            dimension_semantics=("parallel", "arbitrary"),
            vmem_limit_bytes=vmem_limit),
        cost_estimate=cost,
    )(sf, bc, bd, bc, bd)

    # Undo the d-scaling: loss = sum(partials) / d^2.
    return jnp.sum(partials) / jnp.float32(d * d)


def deep_hash_loss_ref(S_F, B_C, B_D, *, lambda1, lambda2, mu):
    d = B_C.shape[1]
    s = mu * S_F
    s = jnp.where(s >= 1.0, 1.0, s)
    t1 = jnp.sum((s - B_C @ B_D.T / d) ** 2)
    t2 = lambda1 * jnp.sum((s - B_C @ B_C.T / d) ** 2)
    t3 = lambda2 * jnp.sum((s - B_D @ B_D.T / d) ** 2)
    return t1 + t2 + t3


def _make_inputs(key, N, d):
    k1, k2, k3 = jax.random.split(key, 3)
    S_F = jax.random.uniform(k1, (N, N), dtype=jnp.float32)           # similarity
    B_C = jnp.sign(jax.random.normal(k2, (N, d), dtype=jnp.float32))  # +/-1 codes
    B_D = jnp.sign(jax.random.normal(k3, (N, d), dtype=jnp.float32))  # +/-1 codes
    return S_F, B_C, B_D


if __name__ == "__main__":
    # DeepHashLoss has no learned parameters; only hyperparameters.
    lambda1, lambda2, mu = 0.1, 0.1, 1.5

    # Small case (exercises padding 16 -> 128, single block).
    N, d = 16, 32
    S_F, B_C, B_D = _make_inputs(jax.random.PRNGKey(0), N, d)
    loss = deep_hash_loss(S_F, B_C, B_D, lambda1=lambda1, lambda2=lambda2, mu=mu)
    loss = jax.block_until_ready(loss)
    ref = deep_hash_loss_ref(S_F, B_C, B_D, lambda1=lambda1, lambda2=lambda2, mu=mu)
    assert jnp.allclose(loss, ref, rtol=1e-5, atol=1e-4), (loss, ref)

    # Multi-block case: exercises the parallel row axis, the column-tiled
    # accumulator path (several "arbitrary" steps), no padding (640 = 5*128).
    N2, d2 = 640, 64
    S_F2, B_C2, B_D2 = _make_inputs(jax.random.PRNGKey(1), N2, d2)
    loss2 = deep_hash_loss(S_F2, B_C2, B_D2,
                           lambda1=lambda1, lambda2=lambda2, mu=mu)
    loss2 = jax.block_until_ready(loss2)
    ref2 = deep_hash_loss_ref(S_F2, B_C2, B_D2,
                              lambda1=lambda1, lambda2=lambda2, mu=mu)
    assert jnp.allclose(loss2, ref2, rtol=1e-5, atol=1e-2), (loss2, ref2)

    print("KERNEL_OK")
</pallas_src>

<mosaic_0001>
module attributes {stable_mosaic.version = 11 : i64} {
  func.func @_deep_hash_loss_kernel(%arg0: i32, %arg1: i32, %arg2: memref<128x128xf32, #tpu.memory_space<vmem>>, %arg3: memref<128x32xbf16, #tpu.memory_space<vmem>>, %arg4: memref<128x32xbf16, #tpu.memory_space<vmem>>, %arg5: memref<128x32xbf16, #tpu.memory_space<vmem>>, %arg6: memref<128x32xbf16, #tpu.memory_space<vmem>>, %arg7: memref<128x1xf32, #tpu.memory_space<vmem>>) attributes {dimension_semantics = [#tpu.dimension_semantics<parallel>, #tpu.dimension_semantics<arbitrary>], iteration_bounds = array<i64: 1, 1>, scalar_prefetch = 0 : i64, scratch_operands = 0 : i64, tpu.core_type = #tpu.core_type<tc>, window_params = [{transform_indices = @transform_0, window_bounds = array<i64: 128, 128>}, {transform_indices = @transform_1, window_bounds = array<i64: 128, 32>}, {transform_indices = @transform_2, window_bounds = array<i64: 128, 32>}, {transform_indices = @transform_3, window_bounds = array<i64: 128, 32>}, {transform_indices = @transform_4, window_bounds = array<i64: 128, 32>}, {transform_indices = @transform_5, window_bounds = array<i64: 128, 1>}]} {
    %c0_i32 = arith.constant 0 : i32
    %0 = arith.cmpi eq, %arg1, %c0_i32 : i32
    %1 = arith.extui %0 : i1 to i32
    %c0_i32_0 = arith.constant 0 : i32
    %2 = arith.cmpi ne, %1, %c0_i32_0 : i32
    scf.if %2 {
      %cst_25 = arith.constant 0.000000e+00 : f32
      %34 = vector.broadcast %cst_25 : f32 to vector<128x1xf32>
      %c0_26 = arith.constant 0 : index
      %c0_27 = arith.constant 0 : index
      %35 = vector.load %arg7[%c0_26, %c0_27] : memref<128x1xf32, #tpu.memory_space<vmem>>, vector<128x1xf32>
      tpu.vector_store %arg7[%c0_26, %c0_27], %34 {strides = array<i32>} : memref<128x1xf32, #tpu.memory_space<vmem>>, vector<128x1xf32>,
    } else {
    }
    %c0 = arith.constant 0 : index
    %c0_1 = arith.constant 0 : index
    %3 = vector.load %arg2[%c0, %c0_1] : memref<128x128xf32, #tpu.memory_space<vmem>>, vector<128x128xf32>
    %cst = arith.constant 4.800000e+01 : f32
    %4 = vector.broadcast %cst : f32 to vector<128x128xf32>
    %5 = arith.mulf %4, %3 : vector<128x128xf32>
    %cst_2 = arith.constant 3.200000e+01 : f32
    %6 = vector.broadcast %cst_2 : f32 to vector<128x128xf32>
    %7 = arith.minimumf %5, %6 : vector<128x128xf32>
    %c0_3 = arith.constant 0 : index
    %c0_4 = arith.constant 0 : index
    %8 = vector.load %arg3[%c0_3, %c0_4] : memref<128x32xbf16, #tpu.memory_space<vmem>>, vector<128x32xbf16>
    %c0_5 = arith.constant 0 : index
    %c0_6 = arith.constant 0 : index
    %9 = vector.load %arg6[%c0_5, %c0_6] : memref<128x32xbf16, #tpu.memory_space<vmem>>, vector<128x32xbf16>
    %cst_7 = arith.constant dense<0.000000e+00> : vector<128x128xf32>
    %10 = tpu.matmul %8, %9, %cst_7 {dimension_numbers = #tpu.dot_dimension_numbers<[1], [1], [0], [0], [0, 0, 1, 0], [], []>} : vector<128x32xbf16>, vector<128x32xbf16>, vector<128x128xf32> -> vector<128x128xf32>
    %c0_8 = arith.constant 0 : index
    %c0_9 = arith.constant 0 : index
    %11 = vector.load %arg3[%c0_8, %c0_9] : memref<128x32xbf16, #tpu.memory_space<vmem>>, vector<128x32xbf16>
    %c0_10 = arith.constant 0 : index
    %c0_11 = arith.constant 0 : index
    %12 = vector.load %arg5[%c0_10, %c0_11] : memref<128x32xbf16, #tpu.memory_space<vmem>>, vector<128x32xbf16>
    %cst_12 = arith.constant dense<0.000000e+00> : vector<128x128xf32>
    %13 = tpu.matmul %11, %12, %cst_12 {dimension_numbers = #tpu.dot_dimension_numbers<[1], [1], [0], [0], [0, 0, 1, 0], [], []>} : vector<128x32xbf16>, vector<128x32xbf16>, vector<128x128xf32> -> vector<128x128xf32>
    %c0_13 = arith.constant 0 : index
    %c0_14 = arith.constant 0 : index
    %14 = vector.load %arg4[%c0_13, %c0_14] : memref<128x32xbf16, #tpu.memory_space<vmem>>, vector<128x32xbf16>
    %c0_15 = arith.constant 0 : index
    %c0_16 = arith.constant 0 : index
    %15 = vector.load %arg6[%c0_15, %c0_16] : memref<128x32xbf16, #tpu.memory_space<vmem>>, vector<128x32xbf16>
    %cst_17 = arith.constant dense<0.000000e+00> : vector<128x128xf32>
    %16 = tpu.matmul %14, %15, %cst_17 {dimension_numbers = #tpu.dot_dimension_numbers<[1], [1], [0], [0], [0, 0, 1, 0], [], []>} : vector<128x32xbf16>, vector<128x32xbf16>, vector<128x128xf32> -> vector<128x128xf32>
    %17 = arith.subf %7, %10 : vector<128x128xf32>
    %18 = arith.mulf %17, %17 : vector<128x128xf32>
    %19 = arith.subf %7, %13 : vector<128x128xf32>
    %20 = arith.mulf %19, %19 : vector<128x128xf32>
    %cst_18 = arith.constant 1.000000e-01 : f32
    %21 = vector.broadcast %cst_18 : f32 to vector<128x128xf32>
    %22 = arith.mulf %21, %20 : vector<128x128xf32>
    %23 = arith.addf %18, %22 : vector<128x128xf32>
    %24 = arith.subf %7, %16 : vector<128x128xf32>
    %25 = arith.mulf %24, %24 : vector<128x128xf32>
    %cst_19 = arith.constant 1.000000e-01 : f32
    %26 = vector.broadcast %cst_19 : f32 to vector<128x128xf32>
    %27 = arith.mulf %26, %25 : vector<128x128xf32>
    %28 = arith.addf %23, %27 : vector<128x128xf32>
    %c0_20 = arith.constant 0 : index
    %c0_21 = arith.constant 0 : index
    %29 = vector.load %arg7[%c0_20, %c0_21] : memref<128x1xf32, #tpu.memory_space<vmem>>, vector<128x1xf32>
    %cst_22 = arith.constant dense<0.000000e+00> : vector<128xf32>
    %30 = vector.multi_reduction <add>, %28, %cst_22 [1] : vector<128x128xf32> to vector<128xf32>
    %31 = vector.shape_cast %30 : vector<128xf32> to vector<128x1xf32>
    %32 = arith.addf %29, %31 : vector<128x1xf32>
    %c0_23 = arith.constant 0 : index
    %c0_24 = arith.constant 0 : index
    %33 = vector.load %arg7[%c0_23, %c0_24] : memref<128x1xf32, #tpu.memory_space<vmem>>, vector<128x1xf32>
    tpu.vector_store %arg7[%c0_23, %c0_24], %32 {strides = array<i32>} : memref<128x1xf32, #tpu.memory_space<vmem>>, vector<128x1xf32>,
    return
  }
  func.func @transform_0(%arg0: i32, %arg1: i32) -> (i32, i32) {
    %c0_i32 = arith.constant 0 : i32
    return %arg0, %arg1 : i32, i32
  }
  func.func @transform_1(%arg0: i32, %arg1: i32) -> (i32, i32) {
    %c0_i32 = arith.constant 0 : i32
    %c0_i32_0 = arith.constant 0 : i32
    return %arg0, %c0_i32 : i32, i32
  }
  func.func @transform_2(%arg0: i32, %arg1: i32) -> (i32, i32) {
    %c0_i32 = arith.constant 0 : i32
    %c0_i32_0 = arith.constant 0 : i32
    return %arg0, %c0_i32 : i32, i32
  }
  func.func @transform_3(%arg0: i32, %arg1: i32) -> (i32, i32) {
    %c0_i32 = arith.constant 0 : i32
    %c0_i32_0 = arith.constant 0 : i32
    return %arg1, %c0_i32 : i32, i32
  }
  func.func @transform_4(%arg0: i32, %arg1: i32) -> (i32, i32) {
    %c0_i32 = arith.constant 0 : i32
    %c0_i32_0 = arith.constant 0 : i32
    return %arg1, %c0_i32 : i32, i32
  }
  func.func @transform_5(%arg0: i32, %arg1: i32) -> (i32, i32) {
    %c0_i32 = arith.constant 0 : i32
    %c0_i32_0 = arith.constant 0 : i32
    return %arg0, %c0_i32 : i32, i32
  }
}

</mosaic_0001>

<bundles_post_ra>
// kernel: tpu_custom_call.1
= control target key start
LH: loop header
LB: loop body
LE: loop exit
PB: predicated region body
PF: predicated region fallthrough
CT: control target
= control target key end

     0   :  { %vm201_vm0 = vcmask 261120   ;;  %vm24_vm1 = vcmask 7168   ;;  %s1407_s3 = inlined_call_operand.vmem [shape: bf16[128,32], index: 3, kind: input, shape index: {}]   ;;  %s1408_s4 = inlined_call_operand.vmem [shape: bf16[128,32], index: 4, kind: input, shape index: {}]   ;;  %s1409_s1 = inlined_call_operand.vmem [shape: bf16[128,32], index: 1, kind: input, shape index: {}]   ;;  %s1410_s2 = inlined_call_operand.vmem [shape: bf16[128,32], index: 2, kind: input, shape index: {}]   ;;  %s1411_s0 = inlined_call_operand.vmem [shape: f32[128,128], index: 0, kind: input, shape index: {}]   ;;  %s1412_s5 = inlined_call_operand.vmem [shape: f32[128,1], index: 5, kind: output, shape index: {}]  }
   0x1   :  { %v977_v0 = vld [vmem:[%s1407_s3 + $0x38] sm:$0xff]  ;;  %v976_v4 = vld [vmem:[%s1407_s3 + $0x30] sm:$0xff]  ;;  %v975_v8 = vld [vmem:[%s1407_s3 + $0x28] sm:$0xff] }
   0x2   :  { %v969_v1 = vld [vmem:[%s1408_s4 + $0x38] sm:$0xff]  ;;  %v1041_v2 = vsel %vm201_vm0, %v977_v0, 0  ;;  %v968_v5 = vld [vmem:[%s1408_s4 + $0x30] sm:$0xff]  ;;  %v374_v6 = vsel %vm201_vm0, %v976_v4, 0  ;;  %v967_v9 = vld [vmem:[%s1408_s4 + $0x28] sm:$0xff]  ;;  %v371_v10 = vsel %vm201_vm0, %v975_v8, 0 }
   0x3   :  { %v248_v3 = vsel %vm201_vm0, %v969_v1, 0  ;;  %379 = vmatpush.bf16.xpose.msra.mxu1 %v1041_v2  ;;  %v245_v7 = vsel %vm201_vm0, %v968_v5, 0  ;;  %v242_v11 = vsel %vm201_vm0, %v967_v9, 0  ;;  %v974_v12 = vld [vmem:[%s1407_s3 + $0x20] sm:$0xff]  ;;  %v973_v16 = vld [vmem:[%s1407_s3 + $0x18] sm:$0xff]  ;;  %v972_v20 = vld [vmem:[%s1407_s3 + $0x10] sm:$0xff] }
   0x4   :  { %508 = vmatpush.bf16.xpose.msra.mxu2 %v248_v3  ;;  %250 = vmatpush.bf16.xpose.msra.mxu0 %v248_v3  ;;  %v966_v13 = vld [vmem:[%s1408_s4 + $0x20] sm:$0xff]  ;;  %v368_v14 = vsel %vm201_vm0, %v974_v12, 0  ;;  %v965_v17 = vld [vmem:[%s1408_s4 + $0x18] sm:$0xff]  ;;  %v365_v18 = vsel %vm201_vm0, %v973_v16, 0  ;;  %v964_v21 = vld [vmem:[%s1408_s4 + $0x10] sm:$0xff]  ;;  %v362_v22 = vsel %vm201_vm0, %v972_v20, 0 }
   0x5   :  { %986 = vmatpush.bf16.xpose.msra.mxu3 %v248_v3  ;;  %v239_v15 = vsel %vm201_vm0, %v966_v13, 0  ;;  %v236_v19 = vsel %vm201_vm0, %v965_v17, 0  ;;  %v233_v23 = vsel %vm201_vm0, %v964_v21, 0  ;;  %v971_v24 = vld [vmem:[%s1407_s3 + $0x8] sm:$0xff]  ;;  %v970_v28 = vld [vmem:[%s1407_s3] sm:$0xff]  ;;  %v960_v36 = vld [vmem:[%s1409_s1 + $0x30] sm:$0xff] }
   0x6   :  { %v963_v25 = vld [vmem:[%s1408_s4 + $0x8] sm:$0xff]  ;;  %v359_v26 = vsel %vm201_vm0, %v971_v24, 0  ;;  %v962_v29 = vld [vmem:[%s1408_s4] sm:$0xff]  ;;  %v356_v30 = vsel %vm201_vm0, %v970_v28, 0  ;;  %v956_v37 = vld [vmem:[%s1409_s1 + $0x10] sm:$0xff] }
   0x7   :  { %v230_v27 = vsel %vm201_vm0, %v963_v25, 0  ;;  %v227_v31 = vsel %vm201_vm0, %v962_v29, 0  ;;  %v954_v32 = vld [vmem:[%s1409_s1] sm:$0xff]  ;;  %v955_v34 = vld [vmem:[%s1409_s1 + $0x8] sm:$0xff]  ;;  %v980_v38 = vld [vmem:[%s1410_s2 + $0x10] sm:$0xff] }
   0x8   :  { %v978_v33 = vld [vmem:[%s1410_s2] sm:$0xff]  ;;  %v979_v35 = vld [vmem:[%s1410_s2 + $0x8] sm:$0xff]  ;;  %v961_v39 = vld [vmem:[%s1409_s1 + $0x38] sm:$0xff] }
   0x9   :  { %v957_v40 = vld [vmem:[%s1409_s1 + $0x18] sm:$0xff]  ;;  %v958_v42 = vld [vmem:[%s1409_s1 + $0x20] sm:$0xff]  ;;  %v959_v44 = vld [vmem:[%s1409_s1 + $0x28] sm:$0xff] }
   0xa   :  { %v981_v41 = vld [vmem:[%s1410_s2 + $0x18] sm:$0xff]  ;;  %v982_v43 = vld [vmem:[%s1410_s2 + $0x20] sm:$0xff]  ;;  %v983_v45 = vld [vmem:[%s1410_s2 + $0x28] sm:$0xff] }
   0xb   :  { %380 = vmatpush.bf16.xpose.msra.mxu1 %v374_v6  ;;  %v984_v46 = vld [vmem:[%s1410_s2 + $0x30] sm:$0xff]  ;;  %v985_v47 = vld [vmem:[%s1410_s2 + $0x38] sm:$0xff]  ;;  %v41_v48 = vld [vmem:[%s1411_s0] sm:$0xff] }
   0xc   :  { %509 = vmatpush.bf16.xpose.msra.mxu2 %v245_v7  ;;  %251 = vmatpush.bf16.xpose.msra.mxu0 %v245_v7  ;;  %v57_v49 = vmul.f32 48.0, %v41_v48  ;;  %v42_v51 = vld [vmem:[%s1411_s0 + $0x8] sm:$0xff]  ;;  %v43_v62 = vld [vmem:[%s1411_s0 + $0x10] sm:$0xff] }
   0xd   :  { %987 = vmatpush.bf16.xpose.msra.mxu3 %v245_v7  ;;  %v58_v55 = vmul.f32 48.0, %v42_v51  ;;  %v59_v5 = vmul.f32 48.0, %v43_v62  ;;  %v47_v62 = vld [vmem:[%s1411_s0 + $0x30] sm:$0xff] }
   0xe   :  { %v73_v50 = vmin.f32 %v57_v49, 32.0 }
   0xf   :  { %v74_v60 = vmin.f32 %v58_v55, 32.0  ;;  %v75_v12 = vmin.f32 %v59_v5, 32.0  ;;  %v63_v5 = vmul.f32 48.0, %v47_v62 }
  0x13   :  { %381 = vmatpush.bf16.xpose.msra.mxu1 %v371_v10 }
  0x14   :  { %510 = vmatpush.bf16.xpose.msra.mxu2 %v242_v11  ;;  %252 = vmatpush.bf16.xpose.msra.mxu0 %v242_v11 }
  0x15   :  { %988 = vmatpush.bf16.xpose.msra.mxu3 %v242_v11 }
  0x1b   :  { %382 = vmatpush.bf16.xpose.msra.mxu1 %v368_v14 }
  0x1c   :  { %511 = vmatpush.bf16.xpose.msra.mxu2 %v239_v15  ;;  %253 = vmatpush.bf16.xpose.msra.mxu0 %v239_v15 }
  0x1d   :  { %989 = vmatpush.bf16.xpose.msra.mxu3 %v239_v15 }
  0x23   :  { %383 = vmatpush.bf16.xpose.msra.mxu1 %v365_v18 }
  0x24   :  { %512 = vmatpush.bf16.xpose.msra.mxu2 %v236_v19  ;;  %254 = vmatpush.bf16.xpose.msra.mxu0 %v236_v19 }
  0x25   :  { %990 = vmatpush.bf16.xpose.msra.mxu3 %v236_v19 }
  0x2b   :  { %384 = vmatpush.bf16.xpose.msra.mxu1 %v362_v22 }
  0x2c   :  { %513 = vmatpush.bf16.xpose.msra.mxu2 %v233_v23  ;;  %255 = vmatpush.bf16.xpose.msra.mxu0 %v233_v23 }
  0x2d   :  { %991 = vmatpush.bf16.xpose.msra.mxu3 %v233_v23 }
  0x33   :  { %385 = vmatpush.bf16.xpose.msra.mxu1 %v359_v26 }
  0x34   :  { %514 = vmatpush.bf16.xpose.msra.mxu2 %v230_v27  ;;  %256 = vmatpush.bf16.xpose.msra.mxu0 %v230_v27 }
  0x35   :  { %992 = vmatpush.bf16.xpose.msra.mxu3 %v230_v27 }
  0x3b   :  { %386 = vmatpush.bf16.xpose.msra.mxu1 %v356_v30 }
  0x3c   :  { %515 = vmatpush.bf16.xpose.msra.mxu2 %v227_v31  ;;  %257 = vmatpush.bf16.xpose.msra.mxu0 %v227_v31 }
  0x3d   :  { %993 = vmatpush.bf16.xpose.msra.mxu3 %v227_v31 }
  0x42   :  { %906 = vmatmul.msk.bf16.vlgmr.msra.gmra.mxu1 %vm201_vm0, %v954_v32 }
  0x43   :  { %946 = vmatmul.msk.bf16.vlgmr.msra.gmra.mxu2 %vm201_vm0, %v978_v33  ;;  %866 = vmatmul.msk.bf16.vlgmr.msra.gmra.mxu0 %vm201_vm0, %v954_v32 }
  0x44   :  { %872 = vmatmul.msk.bf16.vlgmr.msra.gmra.mxu3 %vm201_vm0, %v960_v36 }
  0x45   :  { %994 = vmatpush.bf16.xpose.msrb.mxu3 %v1041_v2 }
  0x4d   :  { %995 = vmatpush.bf16.xpose.msrb.mxu3 %v374_v6 }
  0x52   :  { %907 = vmatmul.msk.bf16.gmra.mxu1 %vm201_vm0, %v955_v34 }
  0x53   :  { %947 = vmatmul.msk.bf16.gmra.mxu2 %vm201_vm0, %v979_v35  ;;  %867 = vmatmul.msk.bf16.gmra.mxu0 %vm201_vm0, %v955_v34 }
  0x54   :  { %873 = vmatmul.msk.bf16.gmra.mxu3 %vm201_vm0, %v961_v39 }
  0x55   :  { %996 = vmatpush.bf16.xpose.msrb.mxu3 %v371_v10 }
  0x5d   :  { %997 = vmatpush.bf16.xpose.msrb.mxu3 %v368_v14  ;;  %v44_v14 = vld [vmem:[%s1411_s0 + $0x18] sm:$0xff] }
  0x5e   :  { %v60_v21 = vmul.f32 48.0, %v44_v14  ;;  %v48_v14 = vld [vmem:[%s1411_s0 + $0x38] sm:$0xff] }
  0x60   :  { %v76_v28 = vmin.f32 %v60_v21, 32.0  ;;  %v64_v21 = vmul.f32 48.0, %v48_v14 }
  0x62   :  { %908 = vmatmul.msk.bf16.gmra.mxu1 %vm201_vm0, %v956_v37 }
  0x63   :  { %948 = vmatmul.msk.bf16.gmra.mxu2 %vm201_vm0, %v980_v38  ;;  %868 = vmatmul.msk.bf16.gmra.mxu0 %vm201_vm0, %v956_v37 }
  0x65   :  { %998 = vmatpush.bf16.xpose.msrb.mxu3 %v365_v18 }
  0x6d   :  { %999 = vmatpush.bf16.xpose.msrb.mxu3 %v362_v22 }
  0x72   :  { %909 = vmatmul.msk.bf16.gmra.mxu1 %vm201_vm0, %v957_v40 }
  0x73   :  { %949 = vmatmul.msk.bf16.gmra.mxu2 %vm201_vm0, %v981_v41  ;;  %869 = vmatmul.msk.bf16.gmra.mxu0 %vm201_vm0, %v957_v40 }
  0x75   :  { %1000 = vmatpush.bf16.xpose.msrb.mxu3 %v359_v26 }
  0x7d   :  { %1001 = vmatpush.bf16.xpose.msrb.mxu3 %v356_v30  ;;  %v45_v30 = vld [vmem:[%s1411_s0 + $0x20] sm:$0xff] }
  0x7e   :  { %v61_v37 = vmul.f32 48.0, %v45_v30  ;;  %v49_v30 = vld [vmem:[%s1411_s0 + $0x40] sm:$0xff] }
  0x82   :  { %910 = vmatmul.msk.bf16.gmra.mxu1 %vm201_vm0, %v958_v42 }
  0x83   :  { %950 = vmatmul.msk.bf16.gmra.mxu2 %vm201_vm0, %v982_v43  ;;  %870 = vmatmul.msk.bf16.gmra.mxu0 %vm201_vm0, %v958_v42 }
  0x84   :  { %913 = vmatmul.msk.bf16.vlgmr.msrb.gmra.mxu3 %vm201_vm0, %v961_v39 }
  0x92   :  { %911 = vmatmul.msk.bf16.gmra.mxu1 %vm201_vm0, %v959_v44 }
  0x93   :  { %951 = vmatmul.msk.bf16.gmra.mxu2 %vm201_vm0, %v983_v45  ;;  %871 = vmatmul.msk.bf16.gmra.mxu0 %vm201_vm0, %v959_v44  ;;  %v77_v44 = vmin.f32 %v61_v37, 32.0  ;;  %v65_v37 = vmul.f32 48.0, %v49_v30 }
  0xa2   :  { %912 = vmatmul.msk.bf16.gmra.mxu1 %vm201_vm0, %v960_v36 }
  0xa3   :  { %952 = vmatmul.msk.bf16.gmra.mxu2 %vm201_vm0, %v984_v46  ;;  %v46_v46 = vld [vmem:[%s1411_s0 + $0x28] sm:$0xff] }
  0xb3   :  { %953 = vmatmul.msk.bf16.gmra.mxu2 %vm201_vm0, %v985_v47 }
  0xbf   :  { %v388_v52 = vpop.f32.mrf.mxu1 }
  0xc0   :  { %v589_v53 = vsub.f32 %v73_v50, %v388_v52  ;;  %v259_v54 = vpop.f32.mrf.mxu0 }
  0xc1   :  { %v557_v56 = vsub.f32 %v73_v50, %v259_v54 }
  0xc2   :  { %v605_v57 = vmul.f32 %v589_v53, %v589_v53  ;;  %v62_v53 = vmul.f32 48.0, %v46_v46  ;;  %v50_v46 = vld [vmem:[%s1411_s0 + $0x48] sm:$0xff] }
  0xc3   :  { %v573_v59 = vmul.f32 %v557_v56, %v557_v56 }
  0xc4   :  { %v621_v58 = vmul.f32 0.1, %v605_v57 }
  0xc6   :  { %v517_v61 = vpop.f32.mrf.mxu2  ;;  %v637_v4 = vadd.f32 %v621_v58, %v573_v59 }
  0xc7   :  { %v653_v63 = vsub.f32 %v73_v50, %v517_v61  ;;  %v390_v0 = vpop.f32.mrf.mxu1 }
  0xc8   :  { %v590_v2 = vsub.f32 %v74_v60, %v390_v0  ;;  %v261_v3 = vpop.f32.mrf.mxu0 }
  0xc9   :  { %v669_v1 = vmul.f32 %v653_v63, %v653_v63  ;;  %v558_v6 = vsub.f32 %v74_v60, %v261_v3 }
  0xca   :  { %v606_v8 = vmul.f32 %v590_v2, %v590_v2 }
  0xcb   :  { %v685_v7 = vmul.f32 0.1, %v669_v1  ;;  %v574_v10 = vmul.f32 %v558_v6, %v558_v6 }
  0xcc   :  { %v622_v9 = vmul.f32 0.1, %v606_v8 }
  0xcd   :  { %v701_v11 = vadd.f32 %v685_v7, %v637_v4 }
  0xce   :  { %v519_v13 = vpop.f32.mrf.mxu2  ;;  %v638_v17 = vadd.f32 %v622_v9, %v574_v10 }
  0xcf   :  { %v654_v15 = vsub.f32 %v74_v60, %v519_v13  ;;  %733 = vadd.xlane.f32.xlu0 %v701_v11  ;;  %v393_v16 = vpop.f32.mrf.mxu1  ;;  %v78_v60 = vmin.f32 %v62_v53, 32.0  ;;  %v66_v53 = vmul.f32 48.0, %v50_v46 }
  0xd0   :  { %v591_v19 = vsub.f32 %v75_v12, %v393_v16  ;;  %v264_v20 = vpop.f32.mrf.mxu0 }
  0xd1   :  { %v670_v18 = vmul.f32 %v654_v15, %v654_v15  ;;  %v559_v22 = vsub.f32 %v75_v12, %v264_v20 }
  0xd2   :  { %v607_v24 = vmul.f32 %v591_v19, %v591_v19 }
  0xd3   :  { %v686_v23 = vmul.f32 0.1, %v670_v18  ;;  %v575_v26 = vmul.f32 %v559_v22, %v559_v22 }
  0xd4   :  { %v623_v25 = vmul.f32 0.1, %v607_v24 }
  0xd5   :  { %v702_v27 = vadd.f32 %v686_v23, %v638_v17 }
  0xd6   :  { %v522_v29 = vpop.f32.mrf.mxu2  ;;  %v639_v36 = vadd.f32 %v623_v25, %v575_v26 }
  0xd7   :  { %v655_v31 = vsub.f32 %v75_v12, %v522_v29  ;;  %735 = vadd.xlane.f32.xlu0 %v702_v27  ;;  %v395_v32 = vpop.f32.mrf.mxu1  ;;  %v79_v12 = vmin.f32 %v63_v5, 32.0 }
  0xd8   :  { %v592_v34 = vsub.f32 %v76_v28, %v395_v32  ;;  %v266_v35 = vpop.f32.mrf.mxu0 }
  0xd9   :  { %v671_v33 = vmul.f32 %v655_v31, %v655_v31  ;;  %v560_v38 = vsub.f32 %v76_v28, %v266_v35 }
  0xda   :  { %v608_v40 = vmul.f32 %v592_v34, %v592_v34 }
  0xdb   :  { %v687_v39 = vmul.f32 0.1, %v671_v33  ;;  %v576_v42 = vmul.f32 %v560_v38, %v560_v38 }
  0xdc   :  { %v624_v41 = vmul.f32 0.1, %v608_v40 }
  0xdd   :  { %v703_v43 = vadd.f32 %v687_v39, %v639_v36 }
  0xde   :  { %v524_v45 = vpop.f32.mrf.mxu2  ;;  %v640_v49 = vadd.f32 %v624_v41, %v576_v42 }
  0xdf   :  { %v656_v47 = vsub.f32 %v76_v28, %v524_v45  ;;  %737 = vadd.xlane.f32.xlu1 %v703_v43  ;;  %v398_v48 = vpop.f32.mrf.mxu1  ;;  %v80_v28 = vmin.f32 %v64_v21, 32.0 }
  0xe0   :  { %v593_v51 = vsub.f32 %v77_v44, %v398_v48  ;;  %v269_v52 = vpop.f32.mrf.mxu0 }
  0xe1   :  { %v672_v50 = vmul.f32 %v656_v47, %v656_v47  ;;  %v561_v54 = vsub.f32 %v77_v44, %v269_v52 }
  0xe2   :  { %v609_v56 = vmul.f32 %v593_v51, %v593_v51 }
  0xe3   :  { %v688_v55 = vmul.f32 0.1, %v672_v50  ;;  %v577_v58 = vmul.f32 %v561_v54, %v561_v54  ;;  %v1204_v54 = vpop.f32.mrf.mxu3 }
  0xe4   :  { %v625_v57 = vmul.f32 0.1, %v609_v56 }
  0xe5   :  { %v704_v59 = vadd.f32 %v688_v55, %v640_v49 }
  0xe6   :  { %v527_v61 = vpop.f32.mrf.mxu2  ;;  %v641_v4 = vadd.f32 %v625_v57, %v577_v58 }
  0xe7   :  { %v657_v63 = vsub.f32 %v77_v44, %v527_v61  ;;  %739 = vadd.xlane.f32.xlu1 %v704_v59  ;;  %v400_v0 = vpop.f32.mrf.mxu1  ;;  %v81_v44 = vmin.f32 %v65_v37, 32.0  ;;  %v82_v61 = vmin.f32 %v66_v53, 32.0 }
  0xe8   :  { %v594_v2 = vsub.f32 %v78_v60, %v400_v0  ;;  %v271_v3 = vpop.f32.mrf.mxu0 }
  0xe9   :  { %v673_v1 = vmul.f32 %v657_v63, %v657_v63  ;;  %v562_v6 = vsub.f32 %v78_v60, %v271_v3  ;;  %v51_v63 = vld [vmem:[%s1411_s0 + $0x50] sm:$0xff] }
  0xea   :  { %v610_v8 = vmul.f32 %v594_v2, %v594_v2 }
  0xeb   :  { %v689_v7 = vmul.f32 0.1, %v673_v1  ;;  %v578_v10 = vmul.f32 %v562_v6, %v562_v6  ;;  %v67_v6 = vmul.f32 48.0, %v51_v63 }
  0xec   :  { %v626_v9 = vmul.f32 0.1, %v610_v8 }
  0xed   :  { %v705_v11 = vadd.f32 %v689_v7, %v641_v4  ;;  %v83_v14 = vmin.f32 %v67_v6, 32.0 }
  0xee   :  { %v529_v13 = vpop.f32.mrf.mxu2  ;;  %v642_v17 = vadd.f32 %v626_v9, %v578_v10  ;;  %v1209_v10 = vpop.f32.mrf.mxu3 }
  0xef   :  { %v658_v15 = vsub.f32 %v78_v60, %v529_v13  ;;  %741 = vadd.xlane.f32.xlu2 %v705_v11  ;;  %v403_v16 = vpop.f32.mrf.mxu1 }
  0xf0   :  { %v595_v19 = vsub.f32 %v79_v12, %v403_v16  ;;  %v274_v20 = vpop.f32.mrf.mxu0  ;;  %v52_v16 = vld [vmem:[%s1411_s0 + $0x58] sm:$0xff] }
  0xf1   :  { %v674_v18 = vmul.f32 %v658_v15, %v658_v15  ;;  %v563_v22 = vsub.f32 %v79_v12, %v274_v20 }
  0xf2   :  { %v611_v24 = vmul.f32 %v595_v19, %v595_v19 }
  0xf3   :  { %v690_v23 = vmul.f32 0.1, %v674_v18  ;;  %v579_v26 = vmul.f32 %v563_v22, %v563_v22 }
  0xf4   :  { %v627_v25 = vmul.f32 0.1, %v611_v24 }
  0xf5   :  { %v706_v27 = vadd.f32 %v690_v23, %v642_v17  ;;  %v68_v23 = vmul.f32 48.0, %v52_v16 }
  0xf6   :  { %v532_v29 = vpop.f32.mrf.mxu2  ;;  %v643_v33 = vadd.f32 %v627_v25, %v579_v26 }
  0xf7   :  { %v659_v31 = vsub.f32 %v79_v12, %v532_v29  ;;  %743 = vadd.xlane.f32.xlu2 %v706_v27  ;;  %v405_v32 = vpop.f32.mrf.mxu1  ;;  %v84_v30 = vmin.f32 %v68_v23, 32.0 }
  0xf8   :  { %v596_v35 = vsub.f32 %v80_v28, %v405_v32  ;;  %v276_v36 = vpop.f32.mrf.mxu0 }
  0xf9   :  { %v675_v34 = vmul.f32 %v659_v31, %v659_v31  ;;  %v564_v38 = vsub.f32 %v80_v28, %v276_v36  ;;  %v1214_v31 = vpop.f32.mrf.mxu3 }
  0xfa   :  { %v612_v40 = vmul.f32 %v596_v35, %v596_v35 }
  0xfb   :  { %v691_v39 = vmul.f32 0.1, %v675_v34  ;;  %v580_v42 = vmul.f32 %v564_v38, %v564_v38  ;;  %v53_v34 = vld [vmem:[%s1411_s0 + $0x60] sm:$0xff] }
  0xfc   :  { %v628_v41 = vmul.f32 0.1, %v612_v40 }
  0xfd   :  { %v707_v43 = vadd.f32 %v691_v39, %v643_v33 }
  0xfe   :  { %v534_v45 = vpop.f32.mrf.mxu2  ;;  %v644_v49 = vadd.f32 %v628_v41, %v580_v42  ;;  %v69_v41 = vmul.f32 48.0, %v53_v34 }
  0xff   :  { %v660_v47 = vsub.f32 %v80_v28, %v534_v45  ;;  %745 = vadd.xlane.f32.xlu0 %v707_v43  ;;  %v408_v48 = vpop.f32.mrf.mxu1 }
 0x100   :  { %v597_v51 = vsub.f32 %v81_v44, %v408_v48  ;;  %v279_v52 = vpop.f32.mrf.mxu0 }
 0x101   :  { %v676_v50 = vmul.f32 %v660_v47, %v660_v47  ;;  %v565_v55 = vsub.f32 %v81_v44, %v279_v52  ;;  %v296_v52 = vpop.f32.mrf.mxu3 }
 0x102   :  { %v613_v57 = vmul.f32 %v597_v51, %v597_v51  ;;  %v54_v51 = vld [vmem:[%s1411_s0 + $0x68] sm:$0xff] }
 0x103   :  { %v692_v56 = vmul.f32 0.1, %v676_v50  ;;  %v581_v59 = vmul.f32 %v565_v55, %v565_v55 }
 0x104   :  { %v629_v58 = vmul.f32 0.1, %v613_v57 }
 0x105   :  { %v708_v60 = vadd.f32 %v692_v56, %v644_v49  ;;  %v85_v49 = vmin.f32 %v69_v41, 32.0 }
 0x106   :  { %v537_v62 = vpop.f32.mrf.mxu2  ;;  %v645_v2 = vadd.f32 %v629_v58, %v581_v59  ;;  %v70_v58 = vmul.f32 48.0, %v54_v51 }
 0x107   :  { %v661_v0 = vsub.f32 %v81_v44, %v537_v62  ;;  %747 = vadd.xlane.f32.xlu1 %v708_v60  ;;  %v410_v1 = vpop.f32.mrf.mxu1  ;;  %v1003_v44 = vmov 0.0   ;;  %v569_v62 = vsub.f32 %v85_v49, %v1204_v54 }
 0x108   :  { %v598_v4 = vsub.f32 %v82_v61, %v410_v1  ;;  %v281_v5 = vpop.f32.mrf.mxu0  ;;  %25 = vst.msk [vmem:[%s1412_s5] sm:$0xff] %vm24_vm1, %v1003_v44  ;;  %v86_v1 = vmin.f32 %v70_v58, 32.0 }
 0x109   :  { %v677_v3 = vmul.f32 %v661_v0, %v661_v0  ;;  %v566_v7 = vsub.f32 %v82_v61, %v281_v5  ;;  %26 = vst.msk [vmem:[%s1412_s5 + $0x8] sm:$0xff] %vm24_vm1, %v1003_v44  ;;  %v585_v5 = vmul.f32 %v569_v62, %v569_v62 }
 0x10a   :  { %v614_v9 = vmul.f32 %v598_v4, %v598_v4  ;;  %27 = vst.msk [vmem:[%s1412_s5 + $0x10] sm:$0xff] %vm24_vm1, %v1003_v44 }
 0x10b   :  { %v693_v8 = vmul.f32 0.1, %v677_v3  ;;  %v582_v12 = vmul.f32 %v566_v7, %v566_v7  ;;  %28 = vst.msk [vmem:[%s1412_s5 + $0x18] sm:$0xff] %vm24_vm1, %v1003_v44 }
 0x10c   :  { %v630_v11 = vmul.f32 0.1, %v614_v9  ;;  %29 = vst.msk [vmem:[%s1412_s5 + $0x20] sm:$0xff] %vm24_vm1, %v1003_v44 }
 0x10d   :  { %v709_v13 = vadd.f32 %v693_v8, %v645_v2  ;;  %30 = vst.msk [vmem:[%s1412_s5 + $0x28] sm:$0xff] %vm24_vm1, %v1003_v44  ;;  %v423_v8 = vpop.f32.mrf.mxu3 }
 0x10e   :  { %v539_v15 = vpop.f32.mrf.mxu2  ;;  %v646_v19 = vadd.f32 %v630_v11, %v582_v12  ;;  %31 = vst.msk [vmem:[%s1412_s5 + $0x30] sm:$0xff] %vm24_vm1, %v1003_v44 }
 0x10f   :  { %v662_v17 = vsub.f32 %v82_v61, %v539_v15  ;;  %749 = vadd.xlane.f32.xlu2 %v709_v13  ;;  %v413_v18 = vpop.f32.mrf.mxu1  ;;  %32 = vst.msk [vmem:[%s1412_s5 + $0x38] sm:$0xff] %vm24_vm1, %v1003_v44  ;;  %v55_v61 = vld [vmem:[%s1411_s0 + $0x70] sm:$0xff]  ;;  %v570_v15 = vsub.f32 %v86_v1, %v1209_v10 }
 0x110   :  { %v599_v21 = vsub.f32 %v83_v14, %v413_v18  ;;  %v284_v22 = vpop.f32.mrf.mxu0  ;;  %33 = vst.msk [vmem:[%s1412_s5 + $0x40] sm:$0xff] %vm24_vm1, %v1003_v44  ;;  %v71_v2 = vmul.f32 48.0, %v55_v61 }
 0x111   :  { %v678_v20 = vmul.f32 %v662_v17, %v662_v17  ;;  %v567_v24 = vsub.f32 %v83_v14, %v284_v22  ;;  %34 = vst.msk [vmem:[%s1412_s5 + $0x48] sm:$0xff] %vm24_vm1, %v1003_v44  ;;  %v586_v22 = vmul.f32 %v570_v15, %v570_v15 }
 0x112   :  { %v615_v26 = vmul.f32 %v599_v21, %v599_v21  ;;  %35 = vst.msk [vmem:[%s1412_s5 + $0x50] sm:$0xff] %vm24_vm1, %v1003_v44  ;;  %v87_v9 = vmin.f32 %v71_v2, 32.0 }
 0x113   :  { %v694_v25 = vmul.f32 0.1, %v678_v20  ;;  %v583_v28 = vmul.f32 %v567_v24, %v567_v24  ;;  %36 = vst.msk [vmem:[%s1412_s5 + $0x58] sm:$0xff] %vm24_vm1, %v1003_v44  ;;  %v721_v62 = vld [vmem:[%s1412_s5 + $0x20] sm:$0xff] }
 0x114   :  { %v631_v27 = vmul.f32 0.1, %v615_v26  ;;  %37 = vst.msk [vmem:[%s1412_s5 + $0x60] sm:$0xff] %vm24_vm1, %v1003_v44  ;;  %v571_v24 = vsub.f32 %v87_v9, %v1214_v31 }
 0x115   :  { %v710_v29 = vadd.f32 %v694_v25, %v646_v19  ;;  %38 = vst.msk [vmem:[%s1412_s5 + $0x68] sm:$0xff] %vm24_vm1, %v1003_v44  ;;  %v603_v19 = vsub.f32 %v87_v9, %v423_v8 }
 0x116   :  { %v542_v32 = vpop.f32.mrf.mxu2  ;;  %v647_v36 = vadd.f32 %v631_v27, %v583_v28  ;;  %39 = vst.msk [vmem:[%s1412_s5 + $0x70] sm:$0xff] %vm24_vm1, %v1003_v44 }
 0x117   :  { %v663_v33 = vsub.f32 %v83_v14, %v542_v32  ;;  %751 = vadd.xlane.f32.xlu0 %v710_v29  ;;  %v415_v35 = vpop.f32.mrf.mxu1  ;;  %40 = vst.msk [vmem:[%s1412_s5 + $0x78] sm:$0xff] %vm24_vm1, %v1003_v44  ;;  %v56_v14 = vld [vmem:[%s1411_s0 + $0x78] sm:$0xff]  ;;  %v619_v26 = vmul.f32 %v603_v19, %v603_v19  ;;  %v425_v29 = vpop.f32.mrf.mxu3 }
 0x118   :  { %v600_v38 = vsub.f32 %v84_v30, %v415_v35  ;;  %v286_v39 = vpop.f32.mrf.mxu0  ;;  %v72_v18 = vmul.f32 48.0, %v56_v14 }
 0x119   :  { %v679_v37 = vmul.f32 %v663_v33, %v663_v33  ;;  %v568_v40 = vsub.f32 %v84_v30, %v286_v39  ;;  %v587_v33 = vmul.f32 %v571_v24, %v571_v24  ;;  %v635_v10 = vmul.f32 0.1, %v619_v26 }
 0x11a   :  { %v616_v43 = vmul.f32 %v600_v38, %v600_v38  ;;  %v88_v25 = vmin.f32 %v72_v18, 32.0  ;;  %v728_v19 = vld [vmem:[%s1412_s5 + $0x58] sm:$0xff] }
 0x11b   :  { %v695_v42 = vmul.f32 0.1, %v679_v37  ;;  %v584_v46 = vmul.f32 %v568_v40, %v568_v40  ;;  %v651_v40 = vadd.f32 %v635_v10, %v587_v33 }
 0x11c   :  { %v632_v45 = vmul.f32 0.1, %v616_v43  ;;  %v604_v34 = vsub.f32 %v88_v25, %v425_v29  ;;  %v572_v37 = vsub.f32 %v88_v25, %v296_v52  ;;  %v718_v52 = vld [vmem:[%s1412_s5 + $0x8] sm:$0xff] }
 0x11d   :  { %v711_v47 = vadd.f32 %v695_v42, %v647_v36 }
 0x11e   :  { %v544_v48 = vpop.f32.mrf.mxu2  ;;  %v648_v55 = vadd.f32 %v632_v45, %v584_v46  ;;  %v620_v38 = vmul.f32 %v604_v34, %v604_v34  ;;  %v588_v31 = vmul.f32 %v572_v37, %v572_v37  ;;  %v717_v45 = vld [vmem:[%s1412_s5] sm:$0xff] }
 0x11f   :  { %v664_v50 = vsub.f32 %v84_v30, %v544_v48  ;;  %753 = vadd.xlane.f32.xlu1 %v711_v47  ;;  %v418_v53 = vpop.f32.mrf.mxu1 }
 0x120   :  { %v601_v57 = vsub.f32 %v85_v49, %v418_v53  ;;  %v636_v43 = vmul.f32 0.1, %v620_v38 }
 0x121   :  { %v680_v56 = vmul.f32 %v664_v50, %v664_v50 }
 0x122   :  { %v617_v60 = vmul.f32 %v601_v57, %v601_v57  ;;  %v652_v50 = vadd.f32 %v636_v43, %v588_v31 }
 0x123   :  { %v696_v59 = vmul.f32 0.1, %v680_v56  ;;  %v719_v56 = vld [vmem:[%s1412_s5 + $0x10] sm:$0xff] }
 0x124   :  { %v633_v3 = vmul.f32 0.1, %v617_v60 }
 0x125   :  { %v712_v63 = vadd.f32 %v696_v59, %v648_v55  ;;  %v720_v59 = vld [vmem:[%s1412_s5 + $0x18] sm:$0xff] }
 0x126   :  { %v547_v0 = vpop.f32.mrf.mxu2  ;;  %v649_v13 = vadd.f32 %v633_v3, %v585_v5 }
 0x127   :  { %v665_v4 = vsub.f32 %v85_v49, %v547_v0  ;;  %755 = vadd.xlane.f32.xlu2 %v712_v63  ;;  %v420_v54 = vpop.f32.mrf.mxu1 }
 0x128   :  { %v602_v7 = vsub.f32 %v86_v1, %v420_v54 }
 0x129   :  { %v681_v6 = vmul.f32 %v665_v4, %v665_v4  ;;  %v723_v4 = vld [vmem:[%s1412_s5 + $0x30] sm:$0xff] }
 0x12a   :  { %v618_v12 = vmul.f32 %v602_v7, %v602_v7 }
 0x12b   :  { %v697_v11 = vmul.f32 0.1, %v681_v6  ;;  %v724_v6 = vld [vmem:[%s1412_s5 + $0x38] sm:$0xff] }
 0x12c   :  { %v634_v20 = vmul.f32 0.1, %v618_v12 }
 0x12d   :  { %v713_v16 = vadd.f32 %v697_v11, %v649_v13  ;;  %v726_v13 = vld [vmem:[%s1412_s5 + $0x48] sm:$0xff] }
 0x12e   :  { %v549_v17 = vpop.f32.mrf.mxu2  ;;  %v650_v28 = vadd.f32 %v634_v20, %v586_v22  ;;  %v729_v22 = vld [vmem:[%s1412_s5 + $0x60] sm:$0xff] }
 0x12f   :  { %v666_v21 = vsub.f32 %v86_v1, %v549_v17  ;;  %757 = vadd.xlane.f32.xlu0 %v713_v16  ;;  %v722_v1 = vld [vmem:[%s1412_s5 + $0x28] sm:$0xff]  ;;  %v727_v16 = vld [vmem:[%s1412_s5 + $0x50] sm:$0xff] }
 0x131   :  { %v682_v23 = vmul.f32 %v666_v21, %v666_v21 }
 0x133   :  { %v698_v27 = vmul.f32 0.1, %v682_v23 }
 0x135   :  { %v714_v30 = vadd.f32 %v698_v27, %v650_v28  ;;  %v731_v28 = vld [vmem:[%s1412_s5 + $0x70] sm:$0xff] }
 0x136   :  { %v552_v32 = vpop.f32.mrf.mxu2 }
 0x137   :  { %v667_v35 = vsub.f32 %v87_v9, %v552_v32  ;;  %759 = vadd.xlane.f32.xlu1 %v714_v30  ;;  %v725_v9 = vld [vmem:[%s1412_s5 + $0x40] sm:$0xff]  ;;  %v732_v32 = vld [vmem:[%s1412_s5 + $0x78] sm:$0xff] }
 0x139   :  { %v683_v36 = vmul.f32 %v667_v35, %v667_v35 }
 0x13b   :  { %v699_v39 = vmul.f32 0.1, %v683_v36 }
 0x13d   :  { %v715_v41 = vadd.f32 %v699_v39, %v651_v40 }
 0x13e   :  { %v554_v42 = vpop.f32.mrf.mxu2 }
 0x13f   :  { %v668_v44 = vsub.f32 %v88_v25, %v554_v42  ;;  %761 = vadd.xlane.f32.xlu2 %v715_v41  ;;  %v730_v25 = vld [vmem:[%s1412_s5 + $0x68] sm:$0xff] }
 0x141   :  { %v684_v46 = vmul.f32 %v668_v44, %v668_v44 }
 0x142   :  { %v734_v47 = vpop.xlane.xlu0 %733 }
 0x143   :  { %v700_v48 = vmul.f32 0.1, %v684_v46  ;;  %v765_v49 = vadd.f32 %v734_v47, %v717_v45 }
 0x145   :  { %782 = vst.msk [vmem:[%s1412_s5] sm:$0xff] %vm24_vm1, %v765_v49  ;;  %v716_v51 = vadd.f32 %v700_v48, %v652_v50 }
 0x147   :  { %763 = vadd.xlane.f32.xlu0 %v716_v51 }
 0x14a   :  { %v736_v53 = vpop.xlane.xlu0 %735 }
 0x14b   :  { %v766_v55 = vadd.f32 %v736_v53, %v718_v52 }
 0x14d   :  { %783 = vst.msk [vmem:[%s1412_s5 + $0x8] sm:$0xff] %vm24_vm1, %v766_v55 }
 0x152   :  { %v738_v57 = vpop.xlane.xlu1 %737 }
 0x153   :  { %v767_v58 = vadd.f32 %v738_v57, %v719_v56 }
 0x155   :  { %784 = vst.msk [vmem:[%s1412_s5 + $0x10] sm:$0xff] %vm24_vm1, %v767_v58 }
 0x15a   :  { %v740_v60 = vpop.xlane.xlu1 %739 }
 0x15b   :  { %v768_v61 = vadd.f32 %v740_v60, %v720_v59 }
 0x15d   :  { %785 = vst.msk [vmem:[%s1412_s5 + $0x18] sm:$0xff] %vm24_vm1, %v768_v61 }
 0x162   :  { %v742_v63 = vpop.xlane.xlu2 %741 }
 0x163   :  { %v769_v0 = vadd.f32 %v742_v63, %v721_v62 }
 0x165   :  { %786 = vst.msk [vmem:[%s1412_s5 + $0x20] sm:$0xff] %vm24_vm1, %v769_v0 }
 0x16a   :  { %v744_v2 = vpop.xlane.xlu2 %743 }
 0x16b   :  { %v770_v3 = vadd.f32 %v744_v2, %v722_v1 }
 0x16d   :  { %787 = vst.msk [vmem:[%s1412_s5 + $0x28] sm:$0xff] %vm24_vm1, %v770_v3 }
 0x172   :  { %v746_v54 = vpop.xlane.xlu0 %745 }
 0x173   :  { %v771_v5 = vadd.f32 %v746_v54, %v723_v4 }
 0x175   :  { %788 = vst.msk [vmem:[%s1412_s5 + $0x30] sm:$0xff] %vm24_vm1, %v771_v5 }
 0x17a   :  { %v748_v7 = vpop.xlane.xlu1 %747 }
 0x17b   :  { %v772_v8 = vadd.f32 %v748_v7, %v724_v6 }
 0x17d   :  { %789 = vst.msk [vmem:[%s1412_s5 + $0x38] sm:$0xff] %vm24_vm1, %v772_v8 }
 0x182   :  { %v750_v11 = vpop.xlane.xlu2 %749 }
 0x183   :  { %v773_v12 = vadd.f32 %v750_v11, %v725_v9 }
 0x185   :  { %790 = vst.msk [vmem:[%s1412_s5 + $0x40] sm:$0xff] %vm24_vm1, %v773_v12 }
 0x18a   :  { %v752_v14 = vpop.xlane.xlu0 %751 }
 0x18b   :  { %v774_v15 = vadd.f32 %v752_v14, %v726_v13 }
 0x18d   :  { %791 = vst.msk [vmem:[%s1412_s5 + $0x48] sm:$0xff] %vm24_vm1, %v774_v15 }
 0x192   :  { %v754_v17 = vpop.xlane.xlu1 %753 }
 0x193   :  { %v775_v18 = vadd.f32 %v754_v17, %v727_v16 }
 0x195   :  { %792 = vst.msk [vmem:[%s1412_s5 + $0x50] sm:$0xff] %vm24_vm1, %v775_v18 }
 0x19a   :  { %v756_v20 = vpop.xlane.xlu2 %755 }
 0x19b   :  { %v776_v21 = vadd.f32 %v756_v20, %v728_v19 }
 0x19d   :  { %793 = vst.msk [vmem:[%s1412_s5 + $0x58] sm:$0xff] %vm24_vm1, %v776_v21 }
 0x1a2   :  { %v758_v23 = vpop.xlane.xlu0 %757 }
 0x1a3   :  { %v777_v24 = vadd.f32 %v758_v23, %v729_v22 }
 0x1a5   :  { %794 = vst.msk [vmem:[%s1412_s5 + $0x60] sm:$0xff] %vm24_vm1, %v777_v24 }
 0x1aa   :  { %v760_v26 = vpop.xlane.xlu1 %759 }
 0x1ab   :  { %v778_v27 = vadd.f32 %v760_v26, %v730_v25 }
 0x1ad   :  { %795 = vst.msk [vmem:[%s1412_s5 + $0x68] sm:$0xff] %vm24_vm1, %v778_v27 }
 0x1b2   :  { %v762_v29 = vpop.xlane.xlu2 %761 }
 0x1b3   :  { %v779_v30 = vadd.f32 %v762_v29, %v731_v28 }
 0x1b5   :  { %796 = vst.msk [vmem:[%s1412_s5 + $0x70] sm:$0xff] %vm24_vm1, %v779_v30 }
 0x1ba   :  { %v764_v33 = vpop.xlane.xlu0 %763 }
 0x1bb   :  { %v780_v10 = vadd.f32 %v764_v33, %v732_v32 }
 0x1bd   :  { %797 = vst.msk [vmem:[%s1412_s5 + $0x78] sm:$0xff] %vm24_vm1, %v780_v10 }

</bundles_post_ra>
